<compile_context>
chip_gen: v7x
topology: tpu7x:2x2x1
jax: 0.10.0
libtpu: 0.0.40
codegen_flags: <defaults>
</compile_context>

<pallas_src>
import jax
import jax.numpy as jnp
from jax.experimental import pallas as pl
from jax.experimental.pallas import tpu as pltpu


def _standard_norm_kernel(params_ref, x_ref, o_ref):
    # params_ref lives in SMEM: [scale, shift]
    scale = params_ref[0]
    shift = params_ref[1]

    x = x_ref[...].astype(jnp.float32)                 # (TB, D)
    d = x.shape[-1]

    mu = jnp.mean(x, axis=-1, keepdims=True)           # (TB, 1), XLU reduce
    centered = x - mu
    # torch.std default is unbiased (divisor D-1). D == 1 -> nan, same as torch.
    var = jnp.sum(centered * centered, axis=-1, keepdims=True) / float(d - 1)
    std = jnp.sqrt(var) + 1e-11
    # One divide per row (exact, keeps parity with torch's per-element divide),
    # folding in `scale`; the per-element work is then a single mul-add.
    inv = scale / std                                   # (TB, 1)
    o_ref[...] = (centered * inv + shift).astype(o_ref.dtype)


def _choose_block_rows(n_rows, d, target_bytes=2 * 1024 * 1024):
    """Pick a row-tile size: ~target_bytes per tile, multiple of 8, and keep
    the grid at >= 2 programs when possible (v7x has 2 TensorCores)."""
    rows = max(8, target_bytes // (d * 4))
    rows = (rows // 8) * 8
    if n_rows >= 16:
        rows = min(rows, ((n_rows // 2) // 8) * 8)
    rows = max(8, min(rows, n_rows))
    return int(rows)


def standard_norm(x, scale=1.0, shift=0.0):
    """x: (B, D) float array. Returns scale*(x - mu_row)/(std_row + 1e-11) + shift."""
    B, D = x.shape
    block_rows = _choose_block_rows(B, D)

    # Pad B up to a multiple of block_rows (padded rows compute `shift`, no NaNs,
    # and are sliced off below).
    Bp = ((B + block_rows - 1) // block_rows) * block_rows
    xp = x if Bp == B else jnp.pad(x, ((0, Bp - B), (0, 0)))

    params = jnp.asarray([scale, shift], dtype=jnp.float32)

    # TODO(synk): for D < 128 the output lane dim is not dense (masked stores);
    # a transposed / padded-lane layout or plain XLA is preferable at tiny D.
    out = pl.pallas_call(
        _standard_norm_kernel,
        out_shape=jax.ShapeDtypeStruct((Bp, D), x.dtype),
        grid_spec=pltpu.PrefetchScalarGridSpec(
            num_scalar_prefetch=1,                      # params -> SMEM
            grid=(Bp // block_rows,),
            in_specs=[pl.BlockSpec((block_rows, D), lambda i, params: (i, 0))],
            out_specs=pl.BlockSpec((block_rows, D), lambda i, params: (i, 0)),
        ),
        compiler_params=pltpu.CompilerParams(
            dimension_semantics=("parallel",),
            vmem_limit_bytes=32 * 1024 * 1024,
        ),
    )(params, xp)

    return out[:B] if Bp != B else out


def _reference(x, scale=1.0, shift=0.0):
    mu = jnp.mean(x, axis=1, keepdims=True)
    std = jnp.std(x, axis=1, ddof=1, keepdims=True) + 1e-11
    return scale * (x - mu) / std + shift


if __name__ == "__main__":
    key = jax.random.PRNGKey(0)
    B, D = 64, 32                      # small (batch, logits) shape consistent with the module
    x = jax.random.normal(key, (B, D), dtype=jnp.float32)

    # Module __init__ defaults: scale=1, shift=0.
    scale, shift = 1.0, 0.0

    y = standard_norm(x, scale=scale, shift=shift)
    y = jax.block_until_ready(y)

    y_ref = _reference(x, scale, shift)
    assert jnp.allclose(y, y_ref, atol=1e-5, rtol=1e-5), "mismatch vs reference"

    print("KERNEL_OK")
</pallas_src>

<mosaic_0001>
module attributes {stable_mosaic.version = 11 : i64} {
  func.func @_standard_norm_kernel(%arg0: i32, %arg1: memref<2xf32, #tpu.memory_space<smem>>, %arg2: memref<32x32xf32, #tpu.memory_space<vmem>>, %arg3: memref<32x32xf32, #tpu.memory_space<vmem>>) attributes {dimension_semantics = [#tpu.dimension_semantics<parallel>], iteration_bounds = array<i64: 2>, scalar_prefetch = 1 : i64, scratch_operands = 0 : i64, tpu.core_type = #tpu.core_type<tc>, window_params = [{transform_indices = @transform_0, window_bounds = array<i64: 32, 32>}, {transform_indices = @transform_1, window_bounds = array<i64: 32, 32>}]} {
    %c0 = arith.constant 0 : index
    %0 = memref.load %arg1[%c0] : memref<2xf32, #tpu.memory_space<smem>>
    %c1 = arith.constant 1 : index
    %1 = memref.load %arg1[%c1] : memref<2xf32, #tpu.memory_space<smem>>
    %c0_0 = arith.constant 0 : index
    %c0_1 = arith.constant 0 : index
    %2 = vector.load %arg2[%c0_0, %c0_1] : memref<32x32xf32, #tpu.memory_space<vmem>>, vector<32x32xf32>
    %cst = arith.constant dense<0.000000e+00> : vector<32xf32>
    %3 = vector.multi_reduction <add>, %2, %cst [1] : vector<32x32xf32> to vector<32xf32>
    %4 = vector.shape_cast %3 : vector<32xf32> to vector<32x1xf32>
    %cst_2 = arith.constant 3.200000e+01 : f32
    %5 = vector.broadcast %cst_2 : f32 to vector<32x1xf32>
    %6 = arith.divf %4, %5 : vector<32x1xf32>
    %7 = vector.broadcast %6 : vector<32x1xf32> to vector<32x32xf32>
    %8 = arith.subf %2, %7 : vector<32x32xf32>
    %9 = arith.mulf %8, %8 : vector<32x32xf32>
    %cst_3 = arith.constant dense<0.000000e+00> : vector<32xf32>
    %10 = vector.multi_reduction <add>, %9, %cst_3 [1] : vector<32x32xf32> to vector<32xf32>
    %11 = vector.shape_cast %10 : vector<32xf32> to vector<32x1xf32>
    %cst_4 = arith.constant 3.100000e+01 : f32
    %12 = vector.broadcast %cst_4 : f32 to vector<32x1xf32>
    %13 = arith.divf %11, %12 : vector<32x1xf32>
    %14 = math.sqrt %13 : vector<32x1xf32>
    %cst_5 = arith.constant 9.99999996E-12 : f32
    %15 = vector.broadcast %cst_5 : f32 to vector<32x1xf32>
    %16 = arith.addf %14, %15 : vector<32x1xf32>
    %17 = vector.broadcast %0 : f32 to vector<32x1xf32>
    %18 = arith.divf %17, %16 : vector<32x1xf32>
    %19 = vector.broadcast %18 : vector<32x1xf32> to vector<32x32xf32>
    %20 = arith.mulf %8, %19 : vector<32x32xf32>
    %21 = vector.broadcast %1 : f32 to vector<32x32xf32>
    %22 = arith.addf %20, %21 : vector<32x32xf32>
    %c0_6 = arith.constant 0 : index
    %c0_7 = arith.constant 0 : index
    %23 = vector.load %arg3[%c0_6, %c0_7] : memref<32x32xf32, #tpu.memory_space<vmem>>, vector<32x32xf32>
    tpu.vector_store %arg3[%c0_6, %c0_7], %22 {strides = array<i32>} : memref<32x32xf32, #tpu.memory_space<vmem>>, vector<32x32xf32>,
    return
  }
  func.func @transform_0(%arg0: i32, %arg1: memref<2xf32, #tpu.memory_space<smem>>) -> (i32, i32) {
    %c0_i32 = arith.constant 0 : i32
    %c0_i32_0 = arith.constant 0 : i32
    return %arg0, %c0_i32 : i32, i32
  }
  func.func @transform_1(%arg0: i32, %arg1: memref<2xf32, #tpu.memory_space<smem>>) -> (i32, i32) {
    %c0_i32 = arith.constant 0 : i32
    %c0_i32_0 = arith.constant 0 : i32
    return %arg0, %c0_i32 : i32, i32
  }
}

</mosaic_0001>

<bundles_post_ra>
// kernel: tpu_custom_call.1
= control target key start
LH: loop header
LB: loop body
LE: loop exit
PB: predicated region body
PF: predicated region fallthrough
CT: control target
= control target key end

     0   :  { %s420_s0 = inlined_call_operand.vmem [shape: f32[2], index: 0, kind: input, shape index: {}]   ;;  %s421_s1 = inlined_call_operand.vmem [shape: f32[64,32], index: 1, kind: input, shape index: {}]   ;;  %s422_s2 = inlined_call_operand.vmem [shape: f32[64,32], index: 2, kind: output, shape index: {}]  }
   0x1   :  { %s7_s11 = sshll.u32 %s420_s0, 4  ;;  %s8_s11 = int_to_ptr.vmem [resolvable:$true] %s7_s11 }
   0x2   :  { %s323_s12 = scalar_lea.vmem %s8_s11, 16  ;;  %p328_p1 = scmp.lt.s32.totalorder %s8_s11, %s8_s11 }
   0x3   :  { %p324_p0 = scmp.ne.s32.totalorder %s8_s11, %s323_s12  ;;  %p329_p2 = scmp.lt.s32.totalorder %s323_s12, %s323_s12 }
   0x5   :  { %p330_p3 = por %p329_p2, %p328_p1 }
   0x7   :  { %p331_p4 = pnand %p330_p3, %p324_p0 }
   0x9   :  { %334 = shalt.err (!%p331_p4)  }
   0xa   :  { %s345_s13 = smov [#allocation3]  }
   0xb   :  { %10 = dma.vmem_to_smem %s8_s11, 16, %s345_s13, [#allocation2] }
   0xc   :  { %339 = dma.done.wait [#allocation2], 16 }
   0xd   :  { %340 = vsyncadd [#allocation2], 4294967280 }
   0xe   :  { %12 = sfence }
   0xf   :  { %s364_s14 = smov 0  }
  0x10 LB: > { %s286_s0 = sadd.s32 4294967295, %s343_s14   ;;  %p290_p5 = scmp.ge.s32.totalorder %s343_s14, 1  ;;  %s343_s14 = sphi %s364_s14, %s18_s14  }
  0x11   : > { %p95_p6 = scmp.lt.s32.totalorder %s343_s14, 3 }
  0x13   : > { %p96_p7 = pnand %p290_p5, %p95_p6 }
  0x14   : > { %s291_s15 = sshll.u32 (!%p96_p7), %s286_s0, 2  ;;  %vm133_vm0 = vcmask (!%p96_p7), 261120   ;;  %s127_s20 = sld [smem:[#allocation3]] (!%p96_p7) }
  0x15   : > { %99 = sbr.rel (%p96_p7) target bundleno = 369 (0x171), region = 24  ;;  %p116_p8 = scmp.lt.s32.totalorder (!%p96_p7), %s291_s15, 7 }
  0x16   : > { %s295_s21 = sld [smem:[#allocation3 + $0x1]] (!%p96_p7) }
  0x1a   : > { %v208_v60 = vstv (!%p96_p7), %s127_s20 }
  0x1c   : > { %s424_s15 = smov (!%p116_p8, %s291_s15), 7  ;;  %v221_v63 = vstv %s295_s21 }
  0x1d   : > { %s292_s16 = sshll.u32 %s424_s15, 3 }
  0x1e   : > { %s119_s19 = scalar_lea.vmem %s421_s1, %s292_s16  ;;  %s125_s24 = scalar_lea.vmem %s422_s2, %s292_s16 }
  0x1f   : > { %v129_v0 = vld [vmem:[%s119_s19] sm:$0xff]  ;;  %v131_v1 = vld [vmem:[%s119_s19 + $0x10] sm:$0xff]  ;;  %v130_v2 = vld [vmem:[%s119_s19 + $0x8] sm:$0xff] }
  0x20   : > { %v134_v3 = vsel %vm133_vm0, %v129_v0, 0.0  ;;  %v140_v4 = vsel %vm133_vm0, %v131_v1, 0.0  ;;  %v132_v5 = vld [vmem:[%s119_s19 + $0x18] sm:$0xff]  ;;  %v137_v6 = vsel %vm133_vm0, %v130_v2, 0.0 }
  0x21   : > { %135 = vadd.xlane.f32.xlu0 %v134_v3  ;;  %141 = vadd.xlane.f32.xlu1 %v140_v4  ;;  %v143_v7 = vsel %vm133_vm0, %v132_v5, 0.0 }
  0x25   : > { %138 = vadd.xlane.f32.xlu0 %v137_v6  ;;  %144 = vadd.xlane.f32.xlu1 %v143_v7 }
  0xae   : > { %v136_v8 = vpop.xlane.xlu0 %135  ;;  %v142_v9 = vpop.xlane.xlu1 %141 }
  0xaf   : > { %v147_v10 = vmul.f32 0.03125, %v136_v8  ;;  %v149_v11 = vmul.f32 0.03125, %v142_v9 }
  0xb1   : > { %v384_v12 = vsub.f32 %v129_v0, %v147_v10  ;;  %v386_v13 = vsub.f32 %v131_v1, %v149_v11 }
  0xb2   : > { %v139_v14 = vpop.xlane.xlu0 %138  ;;  %v145_v15 = vpop.xlane.xlu1 %144 }
  0xb3   : > { %v148_v16 = vmul.f32 0.03125, %v139_v14  ;;  %v150_v17 = vmul.f32 0.03125, %v145_v15  ;;  %v155_v18 = vmul.f32 %v384_v12, %v384_v12  ;;  %v157_v19 = vmul.f32 %v386_v13, %v386_v13 }
  0xb5   : > { %v392_v20 = vsub.f32 %v130_v2, %v148_v16  ;;  %v394_v21 = vsub.f32 %v132_v5, %v150_v17  ;;  %v159_v22 = vsel %vm133_vm0, %v155_v18, 0.0  ;;  %v165_v23 = vsel %vm133_vm0, %v157_v19, 0.0 }
  0xb6   : > { %160 = vadd.xlane.f32.xlu0 %v159_v22 }
  0xb7   : > { %v156_v24 = vmul.f32 %v392_v20, %v392_v20  ;;  %v158_v25 = vmul.f32 %v394_v21, %v394_v21 }
  0xb9   : > { %v162_v26 = vsel %vm133_vm0, %v156_v24, 0.0  ;;  %v168_v27 = vsel %vm133_vm0, %v158_v25, 0.0 }
  0xba   : > { %166 = vadd.xlane.f32.xlu0 %v165_v23  ;;  %163 = vadd.xlane.f32.xlu1 %v162_v26 }
  0xbe   : > { %169 = vadd.xlane.f32.xlu1 %v168_v27 }
 0x143   : > { %v161_v28 = vpop.xlane.xlu0 %160 }
 0x144   : > { %v172_v29 = vmul.f32 0.032258064, %v161_v28 }
 0x146   : > { %307 = vrsqrt.f32 %v172_v29  ;;  %vm178_vm1 = vcmp.eq.f32.partialorder %v172_v29, inf  ;;  %v181_v38 = vand.u32 2147483648, %v172_v29  ;;  %vm180_vm2 = vcmp.eq.f32.partialorder %v172_v29, 0.0 }
 0x147   : > { %v164_v30 = vpop.xlane.xlu1 %163  ;;  %v167_v31 = vpop.xlane.xlu0 %166 }
 0x148   : > { %v173_v32 = vmul.f32 0.032258064, %v164_v30  ;;  %v174_v33 = vmul.f32 0.032258064, %v167_v31 }
 0x14a   : > { %309 = vrsqrt.f32 %v173_v32  ;;  %vm185_vm3 = vcmp.eq.f32.partialorder %v173_v32, inf  ;;  %vm187_vm4 = vcmp.eq.f32.partialorder %v173_v32, 0.0  ;;  %v188_v45 = vand.u32 2147483648, %v173_v32 }
 0x14b   : > { %311 = vrsqrt.f32 %v174_v33  ;;  %v170_v34 = vpop.xlane.xlu1 %169  ;;  %vm192_vm5 = vcmp.eq.f32.partialorder %v174_v33, inf  ;;  %v195_v48 = vand.u32 2147483648, %v174_v33  ;;  %vm194_vm6 = vcmp.eq.f32.partialorder %v174_v33, 0.0 }
 0x14c   : > { %v175_v35 = vmul.f32 0.032258064, %v170_v34 }
 0x14e   : > { %313 = vrsqrt.f32 %v175_v35  ;;  %vm199_vm7 = vcmp.eq.f32.partialorder %v175_v35, inf  ;;  %v202_v56 = vand.u32 2147483648, %v175_v35  ;;  %vm201_vm8 = vcmp.eq.f32.partialorder %v175_v35, 0.0 }
 0x150   : > { %v308_v36 = vpop.eup %307 }
 0x151   : > { %v177_v37 = vmul.f32 %v308_v36, %v172_v29 }
 0x153   : > { %v179_v39 = vsel %vm178_vm1, %v172_v29, %v177_v37 }
 0x154   : > { %v310_v40 = vpop.eup %309  ;;  %v182_v41 = vsel %vm180_vm2, %v181_v38, %v179_v39 }
 0x155   : > { %v312_v42 = vpop.eup %311  ;;  %v204_v43 = vadd.f32 1e-11, %v182_v41  ;;  %v184_v44 = vmul.f32 %v310_v40, %v173_v32 }
 0x156   : > { %v191_v46 = vmul.f32 %v312_v42, %v174_v33 }
 0x157   : > { %315 = vrcp.f32 %v204_v43  ;;  %v186_v47 = vsel %vm185_vm3, %v173_v32, %v184_v44 }
 0x158   : > { %v314_v49 = vpop.eup %313  ;;  %v189_v50 = vsel %vm187_vm4, %v188_v45, %v186_v47  ;;  %v193_v51 = vsel %vm192_vm5, %v174_v33, %v191_v46 }
 0x159   : > { %v205_v52 = vadd.f32 1e-11, %v189_v50  ;;  %v196_v53 = vsel %vm194_vm6, %v195_v48, %v193_v51  ;;  %v198_v54 = vmul.f32 %v314_v49, %v175_v35 }
 0x15a   : > { %v206_v55 = vadd.f32 1e-11, %v196_v53 }
 0x15b   : > { %317 = vrcp.f32 %v205_v52  ;;  %v200_v57 = vsel %vm199_vm7, %v175_v35, %v198_v54 }
 0x15c   : > { %319 = vrcp.f32 %v206_v55  ;;  %v203_v58 = vsel %vm201_vm8, %v202_v56, %v200_v57 }
 0x15d   : > { %v207_v59 = vadd.f32 1e-11, %v203_v58 }
 0x15f   : > { %321 = vrcp.f32 %v207_v59 }
 0x161   : > { %v316_v61 = vpop.eup %315 }
 0x162   : > { %v210_v62 = vmul.f32 %v316_v61, %v208_v60 }
 0x164   : > { %v217_v0 = vmul.f32 %v210_v62, %v384_v12 }
 0x165   : > { %v318_v1 = vpop.eup %317 }
 0x166   : > { %v320_v2 = vpop.eup %319  ;;  %v222_v3 = vadd.f32 %v221_v63, %v217_v0  ;;  %v212_v4 = vmul.f32 %v318_v1, %v208_v60 }
 0x167   : > { %v214_v5 = vmul.f32 %v320_v2, %v208_v60 }
 0x168   : > { %226 = vst.msk [vmem:[%s125_s24] sm:$0xff] %vm133_vm0, %v222_v3  ;;  %v218_v6 = vmul.f32 %v212_v4, %v392_v20 }
 0x169   : > { %v322_v7 = vpop.eup %321  ;;  %v219_v8 = vmul.f32 %v214_v5, %v386_v13 }
 0x16a   : > { %v223_v9 = vadd.f32 %v221_v63, %v218_v6  ;;  %v216_v10 = vmul.f32 %v322_v7, %v208_v60 }
 0x16b   : > { %v224_v11 = vadd.f32 %v221_v63, %v219_v8 }
 0x16c   : > { %227 = vst.msk [vmem:[%s125_s24 + $0x8] sm:$0xff] %vm133_vm0, %v223_v9  ;;  %v220_v12 = vmul.f32 %v216_v10, %v394_v21 }
 0x16d   : > { %228 = vst.msk [vmem:[%s125_s24 + $0x10] sm:$0xff] %vm133_vm0, %v224_v11 }
 0x16e   : > { %v225_v14 = vadd.f32 %v221_v63, %v220_v12 }
 0x170   : > { %229 = vst.msk [vmem:[%s125_s24 + $0x18] sm:$0xff] %vm133_vm0, %v225_v14 }
 0x171 PF: > { %s18_s14 = sadd.s32 1, %s343_s14  }
 0x172   : > { %p15_p9 = scmp.ge.s32.totalorder %s18_s14, 4  }
 0x174   :  { %17 = sbr.rel (!%p15_p9) target bundleno = 16 (0x10), region = 54 }

</bundles_post_ra>
